<compile_context>
chip_gen: v6e
topology: v6e:2x2x1
jax: 0.10.0
libtpu: 0.0.40
codegen_flags: <defaults>
</compile_context>

<pallas_src>
import functools

import jax
import jax.numpy as jnp
from jax.experimental import pallas as pl
from jax.experimental.pallas import tpu as pltpu


def _kd_loss_kernel(s_ref, t_ref, o_ref, *, inv_T: float, n_rows: int,
                    tile_n: int, needs_mask: bool):
    """One (TILE_N, C) row tile -> unnormalized KL partial sum (f32, SMEM)."""
    # Load (possibly bf16) logits and compute in f32; divide-by-T as a mul.
    s = s_ref[...].astype(jnp.float32) * inv_T
    t = t_ref[...].astype(jnp.float32) * inv_T

    if needs_mask:
        # Partial last block: rows past N hold stale VMEM contents.  Zero the
        # logits BEFORE the exp/log path; zero logits give uniform student and
        # teacher distributions, so their KL contribution is exactly 0.
        row_id = (pl.program_id(0) * tile_n
                  + jax.lax.broadcasted_iota(jnp.int32, (tile_n, 1), 0))
        valid = row_id < n_rows
        s = jnp.where(valid, s, 0.0)
        t = jnp.where(valid, t, 0.0)

    # Student log-softmax pieces (only the shift and the per-row LSE are kept).
    s_shift = s - jnp.max(s, axis=1, keepdims=True)
    s_lse = jnp.log(jnp.sum(jnp.exp(s_shift), axis=1, keepdims=True))

    # Teacher softmax pieces.
    t_shift = t - jnp.max(t, axis=1, keepdims=True)
    t_exp = jnp.exp(t_shift)
    t_sum = jnp.sum(t_exp, axis=1, keepdims=True)

    # sum_c p_t*(log p_t - log p_s)
    #   = [ sum_c t_exp*(t_shift - s_shift) + (s_lse - log t_sum)*t_sum ] / t_sum
    # (per-element broadcast add hoisted to a per-row term).
    row_kl = (jnp.sum(t_exp * (t_shift - s_shift), axis=1, keepdims=True)
              + (s_lse - jnp.log(t_sum)) * t_sum)                    # (TILE_N, 1)
    tile_kl = jnp.sum(row_kl * pl.reciprocal(t_sum, approx=False))   # scalar

    o_ref[0, 0] = tile_kl


def _round_up(x: int, m: int) -> int:
    return ((x + m - 1) // m) * m


def _vmem_capacity_bytes() -> int:
    try:
        return int(pltpu.get_tpu_info().vmem_capacity_bytes)
    except Exception:
        return 64 * 1024 * 1024  # conservative: v7x per-TensorCore VMEM


def _choose_tile_n(N: int, C: int, in_itemsize: int, max_tile_rows: int):
    """Pick tile_n (rows per grid step) and whether tail-row masking is needed."""
    # Per-row VMEM footprint: 2 inputs x 2 pipeline buffers in the input dtype
    # plus ~5 f32 tile-sized temporaries (s, t, t_shift, t_exp, products).
    vmem_per_row = 2 * 2 * C * in_itemsize + 5 * C * 4

    # Generation-aware budget: big blocks on 128 MiB chips (v5e/v6e), keep
    # plenty of headroom on v7x's 64 MiB per-TC VMEM.
    cap = _vmem_capacity_bytes()
    budget = (64 << 20) if cap >= (100 << 20) else (28 << 20)

    rows = max(8, budget // vmem_per_row)
    rows = min(rows, max_tile_rows)
    if N >= 16:
        # v7x has 2 TensorCores: guarantee the parallel batch axis has >= 2
        # tiles (costs nothing on single-TC v5e/v6e).
        rows = min(rows, _round_up(-(-N // 2), 8))
    rows = min(rows, _round_up(N, 8))
    rows = max(8, (rows // 8) * 8)

    if N <= rows:
        # Single full-extent block (block dim == array dim, any N allowed).
        tile_n, needs_mask = N, False
    else:
        # Prefer a multiple-of-8 divisor of N under the budget (no masking,
        # no padding); otherwise take a partial last block and mask in-kernel.
        tile_n, needs_mask = 0, True
        for t in range(rows, 7, -8):
            if N % t == 0:
                tile_n, needs_mask = t, False
                break
        if tile_n == 0:
            tile_n = rows

    vmem_need = tile_n * vmem_per_row
    return tile_n, needs_mask, vmem_need


def kd_loss(out_s: jax.Array, out_t: jax.Array, T: float,
            *, max_tile_rows: int = 2048) -> jax.Array:
    """Pallas implementation of KDLoss(T).forward(out_s, out_t). Returns scalar."""
    assert out_s.shape == out_t.shape and out_s.ndim == 2
    N, C = out_s.shape
    in_itemsize = jnp.dtype(out_s.dtype).itemsize

    tile_n, needs_mask, vmem_need = _choose_tile_n(N, C, in_itemsize,
                                                   max_tile_rows)
    num_tiles = pl.cdiv(N, tile_n)

    kernel = functools.partial(_kd_loss_kernel, inv_T=1.0 / float(T),
                               n_rows=N, tile_n=tile_n, needs_mask=needs_mask)

    partials = pl.pallas_call(
        kernel,
        out_shape=jax.ShapeDtypeStruct((num_tiles, 1), jnp.float32),
        grid=(num_tiles,),
        in_specs=[
            pl.BlockSpec((tile_n, C), lambda i: (i, 0)),
            pl.BlockSpec((tile_n, C), lambda i: (i, 0)),
        ],
        # One f32 partial per tile, written to SMEM (no masked lane-sparse vst).
        out_specs=pl.BlockSpec((1, 1), lambda i: (i, 0),
                               memory_space=pltpu.SMEM),
        compiler_params=pltpu.CompilerParams(
            dimension_semantics=("parallel",),
            vmem_limit_bytes=int(vmem_need) + (8 << 20),
        ),
    )(out_s, out_t)

    # Single final reduction + the one-time /N * T^2 scaling (true N).
    return jnp.sum(partials) * (float(T) * float(T) / N)


def _kd_loss_ref(out_s, out_t, T):
    """Pure-JAX reference for validation."""
    s = out_s.astype(jnp.float32) / T
    t = out_t.astype(jnp.float32) / T
    log_p_s = jax.nn.log_softmax(s, axis=1)
    p_t = jax.nn.softmax(t, axis=1)
    log_p_t = jax.nn.log_softmax(t, axis=1)
    kl = jnp.sum(p_t * (log_p_t - log_p_s))
    return kl / out_s.shape[0] * T * T


if __name__ == "__main__":
    key = jax.random.PRNGKey(0)
    k1, k2, k3, k4 = jax.random.split(key, 4)
    T = 4.0

    # Small classifier-style logits (single full-extent tile path).
    N, C = 8, 32
    s1 = jax.random.normal(k1, (N, C), dtype=jnp.float32)
    t1 = jax.random.normal(k2, (N, C), dtype=jnp.float32)
    l1 = jax.block_until_ready(kd_loss(s1, t1, T))
    r1 = _kd_loss_ref(s1, t1, T)
    assert jnp.allclose(l1, r1, rtol=2e-3, atol=1e-5), (l1, r1)

    # Odd batch, bf16 logits, multi-tile grid with a partial last block
    # (exercises in-kernel tail-row masking, SMEM per-tile partials and the
    # wrapper-side reduction) -- no jnp.pad round trip anymore.
    s2 = jax.random.normal(k3, (100, 384), dtype=jnp.bfloat16)
    t2 = jax.random.normal(k4, (100, 384), dtype=jnp.bfloat16)
    l2 = jax.block_until_ready(kd_loss(s2, t2, T, max_tile_rows=32))
    r2 = _kd_loss_ref(s2, t2, T)
    assert jnp.allclose(l2, r2, rtol=2e-3, atol=1e-5), (l2, r2)

    print("KERNEL_OK")
</pallas_src>

<mosaic_0001>
module attributes {stable_mosaic.version = 11 : i64} {
  func.func @_kd_loss_kernel(%arg0: i32, %arg1: memref<8x32xf32, #tpu.memory_space<vmem>>, %arg2: memref<8x32xf32, #tpu.memory_space<vmem>>, %arg3: memref<1x1xf32, #tpu.memory_space<smem>>) attributes {dimension_semantics = [#tpu.dimension_semantics<parallel>], iteration_bounds = array<i64: 1>, scalar_prefetch = 0 : i64, scratch_operands = 0 : i64, tpu.core_type = #tpu.core_type<tc>, window_params = [{transform_indices = @transform_0, window_bounds = array<i64: 8, 32>}, {transform_indices = @transform_1, window_bounds = array<i64: 8, 32>}, {transform_indices = @transform_2, window_bounds = array<i64: 1, 1>}]} {
    %c0 = arith.constant 0 : index
    %c0_0 = arith.constant 0 : index
    %0 = vector.load %arg1[%c0, %c0_0] : memref<8x32xf32, #tpu.memory_space<vmem>>, vector<8x32xf32>
    %cst = arith.constant 2.500000e-01 : f32
    %1 = vector.broadcast %cst : f32 to vector<8x32xf32>
    %2 = arith.mulf %0, %1 : vector<8x32xf32>
    %c0_1 = arith.constant 0 : index
    %c0_2 = arith.constant 0 : index
    %3 = vector.load %arg2[%c0_1, %c0_2] : memref<8x32xf32, #tpu.memory_space<vmem>>, vector<8x32xf32>
    %cst_3 = arith.constant 2.500000e-01 : f32
    %4 = vector.broadcast %cst_3 : f32 to vector<8x32xf32>
    %5 = arith.mulf %3, %4 : vector<8x32xf32>
    %cst_4 = arith.constant dense<0xFF800000> : vector<8xf32>
    %6 = vector.multi_reduction <maximumf>, %2, %cst_4 [1] : vector<8x32xf32> to vector<8xf32>
    %7 = vector.shape_cast %6 : vector<8xf32> to vector<8x1xf32>
    %8 = vector.broadcast %7 : vector<8x1xf32> to vector<8x32xf32>
    %9 = arith.subf %2, %8 : vector<8x32xf32>
    %10 = math.exp %9 : vector<8x32xf32>
    %cst_5 = arith.constant dense<0.000000e+00> : vector<8xf32>
    %11 = vector.multi_reduction <add>, %10, %cst_5 [1] : vector<8x32xf32> to vector<8xf32>
    %12 = vector.shape_cast %11 : vector<8xf32> to vector<8x1xf32>
    %13 = math.log %12 : vector<8x1xf32>
    %cst_6 = arith.constant dense<0xFF800000> : vector<8xf32>
    %14 = vector.multi_reduction <maximumf>, %5, %cst_6 [1] : vector<8x32xf32> to vector<8xf32>
    %15 = vector.shape_cast %14 : vector<8xf32> to vector<8x1xf32>
    %16 = vector.broadcast %15 : vector<8x1xf32> to vector<8x32xf32>
    %17 = arith.subf %5, %16 : vector<8x32xf32>
    %18 = math.exp %17 : vector<8x32xf32>
    %cst_7 = arith.constant dense<0.000000e+00> : vector<8xf32>
    %19 = vector.multi_reduction <add>, %18, %cst_7 [1] : vector<8x32xf32> to vector<8xf32>
    %20 = vector.shape_cast %19 : vector<8xf32> to vector<8x1xf32>
    %21 = arith.subf %17, %9 : vector<8x32xf32>
    %22 = arith.mulf %18, %21 : vector<8x32xf32>
    %cst_8 = arith.constant dense<0.000000e+00> : vector<8xf32>
    %23 = vector.multi_reduction <add>, %22, %cst_8 [1] : vector<8x32xf32> to vector<8xf32>
    %24 = vector.shape_cast %23 : vector<8xf32> to vector<8x1xf32>
    %25 = math.log %20 : vector<8x1xf32>
    %26 = arith.subf %13, %25 : vector<8x1xf32>
    %27 = arith.mulf %26, %20 : vector<8x1xf32>
    %28 = arith.addf %24, %27 : vector<8x1xf32>
    %29 = tpu.reciprocal %20 : vector<8x1xf32> -> vector<8x1xf32>
    %30 = arith.mulf %28, %29 : vector<8x1xf32>
    %31 = vector.shape_cast %30 : vector<8x1xf32> to vector<1x8x1xf32>
    %cst_9 = arith.constant dense<0.000000e+00> : vector<1xf32>
    %32 = vector.multi_reduction <add>, %31, %cst_9 [1, 2] : vector<1x8x1xf32> to vector<1xf32>
    %33 = vector.shape_cast %32 : vector<1xf32> to vector<1x1x1xf32>
    %34 = vector.extract %33[0, 0, 0] : f32 from vector<1x1x1xf32>
    %c0_10 = arith.constant 0 : index
    %c0_11 = arith.constant 0 : index
    %35 = memref.load %arg3[%c0_10, %c0_11] : memref<1x1xf32, #tpu.memory_space<smem>>
    memref.store %34, %arg3[%c0_10, %c0_11] : memref<1x1xf32, #tpu.memory_space<smem>>
    return
  }
  func.func @transform_0(%arg0: i32) -> (i32, i32) {
    %c0_i32 = arith.constant 0 : i32
    %c0_i32_0 = arith.constant 0 : i32
    return %arg0, %c0_i32 : i32, i32
  }
  func.func @transform_1(%arg0: i32) -> (i32, i32) {
    %c0_i32 = arith.constant 0 : i32
    %c0_i32_0 = arith.constant 0 : i32
    return %arg0, %c0_i32 : i32, i32
  }
  func.func @transform_2(%arg0: i32) -> (i32, i32) {
    %c0_i32 = arith.constant 0 : i32
    %c0_i32_0 = arith.constant 0 : i32
    return %arg0, %c0_i32 : i32, i32
  }
}

</mosaic_0001>

<bundles_post_ra>
// kernel: tpu_custom_call.1
= control target key start
LH: loop header
LB: loop body
LE: loop exit
PB: predicated region body
PF: predicated region fallthrough
CT: control target
= control target key end

     0   :  { %7 = vsyncpa [#allocation3], 0  ;;  %s202_s0 = inlined_call_operand.hbm [shape: f32[8,32], index: 0, kind: input, shape index: {}]   ;;  %s203_s1 = inlined_call_operand.hbm [shape: f32[8,32], index: 1, kind: input, shape index: {}]   ;;  %s204_s2 = inlined_call_operand.hbm [shape: f32[1,1], index: 2, kind: output, shape index: {}]  }
   0x1   :  { %8 = vsyncpa [#allocation6], 0 }
   0x2   :  { %9 = vsyncpa [#allocation4], 0  ;;  %s170_s9 = smov [#allocation2]   ;;  %s171_s11 = smov [#allocation5]  }
   0x3   :  { %s16_s10 = sshll.u32 %s170_s9, 4  ;;  %s26_s12 = sshll.u32 %s171_s11, 4  ;;  %s17_s10 = int_to_ptr.vmem [resolvable:$true] %s16_s10  ;;  %s27_s12 = int_to_ptr.vmem [resolvable:$true] %s26_s12 }
   0x4   :  { %s124_s13 = scalar_lea.vmem %s17_s10, 128  ;;  %p129_p1 = scmp.lt.s32.totalorder %s17_s10, %s17_s10 }
   0x5   :  { %p125_p0 = scmp.ne.s32.totalorder %s17_s10, %s124_s13  ;;  %p130_p2 = scmp.lt.s32.totalorder %s124_s13, %s124_s13 }
   0x7   :  { %p131_p3 = por %p130_p2, %p129_p1 }
   0x9   :  { %p132_p4 = pnand %p131_p3, %p125_p0 }
   0xb   :  { %135 = shalt.err (!%p132_p4)
}
   0xc   :  { %19 = dma.hbm_to_vmem [thread:$0]  %s202_s0, 128, %s17_s10, [#allocation3]  }
   0xd   :  { %s144_s16 = scalar_lea.vmem %s27_s12, 128  ;;  %p149_p6 = scmp.lt.s32.totalorder %s27_s12, %s27_s12 }
   0xe   :  { %p145_p5 = scmp.ne.s32.totalorder %s27_s12, %s144_s16  ;;  %p150_p7 = scmp.lt.s32.totalorder %s144_s16, %s144_s16 }
  0x10   :  { %p151_p8 = por %p150_p7, %p149_p6 }
  0x12   :  { %p152_p9 = pnand %p151_p8, %p145_p5 }
  0x14   :  { %155 = shalt.err (!%p152_p9)
}
  0x15   :  { %29 = dma.hbm_to_vmem [thread:$0]  %s203_s1, 128, %s27_s12, [#allocation6]  }
  0x16   :  { %164 = dma.done.wait [#allocation3], 128  }
  0x17   :  { %165 = vsyncadd [#allocation3], 4294967168 }
  0x18   :  { %166 = dma.done.wait [#allocation6], 128  }
  0x19   :  { %167 = vsyncadd [#allocation6], 4294967168  ;;  %v36_v0 = vld [vmem:[#allocation2] sm:$0xff]  ;;  %vm40_vm0 = vcmask 261120   ;;  %v38_v1 = vld [vmem:[#allocation5] sm:$0xff]  ;;  %vm73_vm1 = vcmask 7168  }
  0x1a   :  { %v37_v2 = vmul.f32 0.25, %v36_v0  ;;  %v39_v3 = vmul.f32 0.25, %v38_v1  ;;  %s172_s1 = smov [#allocation7]  }
  0x1c   :  { %v41_v4 = vsel %vm40_vm0, %v37_v2, -inf  ;;  %v52_v5 = vsel %vm40_vm0, %v39_v3, -inf }
  0x1d   :  { %42 = vmax.xlane.f32.xlu0 %v41_v4 }
  0x21   :  { %53 = vmax.xlane.f32.xlu0 %v52_v5 }
  0xa6   :  { %v43_v6 = vpop.xlane.xlu0 %42 }
  0xa7   :  { %v44_v7 = vsub.f32 %v37_v2, %v43_v6 }
  0xa9   :  { %v45_v8 = vmul.f32 1.442695, %v44_v7 }
  0xaa   :  { %v54_v9 = vpop.xlane.xlu0 %53 }
  0xab   :  { %106 = vpow2.f32 %v45_v8  ;;  %v55_v10 = vsub.f32 %v39_v3, %v54_v9 }
  0xad   :  { %v56_v11 = vmul.f32 1.442695, %v55_v10  ;;  %v61_v14 = vsub.f32 %v55_v10, %v44_v7 }
  0xaf   :  { %108 = vpow2.f32 %v56_v11 }
  0xb8   :  { %v107_v12 = vpop.eup %106 }
  0xb9   :  { %v47_v13 = vsel %vm40_vm0, %v107_v12, 0.0 }
  0xba   :  { %48 = vadd.xlane.f32.xlu1 %v47_v13 }
  0xbc   :  { %v109_v15 = vpop.eup %108 }
  0xbd   :  { %v58_v16 = vsel %vm40_vm0, %v109_v15, 0.0  ;;  %v62_v17 = vmul.f32 %v109_v15, %v61_v14 }
  0xbe   :  { %59 = vadd.xlane.f32.xlu1 %v58_v16 }
  0xbf   :  { %v63_v18 = vsel %vm40_vm0, %v62_v17, 0.0 }
  0xc0   :  { %64 = vadd.xlane.f32.xlu0 %v63_v18 }
 0x143   :  { %v49_v19 = vpop.xlane.xlu1 %48 }
 0x144   :  { %110 = vlog2.f32 %v49_v19 }
 0x147   :  { %v60_v20 = vpop.xlane.xlu1 %59 }
 0x148   :  { %112 = vlog2.f32 %v60_v20 }
 0x149   :  { %114 = vrcp.f32 %v60_v20  ;;  %v65_v27 = vpop.xlane.xlu0 %64 }
 0x151   :  { %v111_v21 = vpop.eup %110 }
 0x152   :  { %v51_v23 = vmul.f32 0.6931472, %v111_v21 }
 0x155   :  { %v113_v22 = vpop.eup %112 }
 0x156   :  { %v67_v24 = vmul.f32 0.6931472, %v113_v22  ;;  %v115_v29 = vpop.eup %114 }
 0x158   :  { %v68_v25 = vsub.f32 %v51_v23, %v67_v24 }
 0x15a   :  { %v69_v26 = vmul.f32 %v68_v25, %v60_v20 }
 0x15c   :  { %v70_v28 = vadd.f32 %v69_v26, %v65_v27 }
 0x15e   :  { %v72_v30 = vmul.f32 %v115_v29, %v70_v28 }
 0x160   :  { %v74_v31 = vsel %vm73_vm1, %v72_v30, 0.0 }
 0x161   :  { %75 = vadd.xlane.f32.xlu1 %v74_v31 }
 0x1ea   :  { %v76_v32 = vpop.xlane.xlu1 %75 }
 0x1eb   :  { %v77_v33 = vrot.slane %v76_v32, 4 }
 0x1ed   :  { %v78_v34 = vadd.f32 %v77_v33, %v76_v32 }
 0x1ef   :  { %v79_v35 = vrot.slane %v78_v34, 2 }
 0x1f1   :  { %v80_v36 = vadd.f32 %v79_v35, %v78_v34 }
 0x1f3   :  { %v81_v37 = vrot.slane %v80_v36, 1 }
 0x1f5   :  { %v82_v38 = vadd.f32 %v81_v37, %v80_v36 }
 0x1f7   :  { %101 = vpush %v82_v38 }
 0x228   :  { %s102_s0 = spop %101 }
 0x229   :  { %85 = sst [smem:[#allocation7]] %s102_s0 }
 0x22a   :  { %93 = dma.smem_to_hbm %s172_s1, 16, %s204_s2, [#allocation4]  }
 0x22b   :  { %168 = dma.done.wait [#allocation4], 16  }
 0x22c   :  { %169 = vsyncadd [#allocation4], 4294967280 }
 0x22d   :  { %97 = sfence }
 0x22e   :  { %98 = vsyncpa [#allocation3], 1 }
 0x22f   :  { %99 = vsyncpa [#allocation6], 1 }
 0x230   :  { %100 = vsyncpa [#allocation4], 1 }

</bundles_post_ra>
